<compile_context>
chip_gen: v7x
topology: tpu7x:2x2x1
jax: 0.10.0
libtpu: 0.0.40
codegen_flags: <defaults>
</compile_context>

<pallas_src>
import functools

import jax
import jax.numpy as jnp
from jax.experimental import pallas as pl
from jax.experimental.pallas import tpu as pltpu

LANE = 128                   # vreg lane width
SUBLANE = 8                  # vreg sublane count
# 16384 x 128 f32 = 8 MiB per input tile.  Worst case (both inputs f32) the
# double-buffered pipeline holds 2 inputs x 2 bufs x 8 MiB = 32 MiB, which fits
# v7x's 64 MiB physical VMEM (48 MiB limit below) and is small on v5e/v6e.
TARGET_BLOCK_ROWS = 16 * 1024


def _round_up(x, m):
    return (x + m - 1) // m * m


def _tpu_config():
    """(physical VMEM bytes, chip has two TensorCores) with safe fallbacks."""
    vmem_cap = None
    try:
        vmem_cap = int(pltpu.get_tpu_info().vmem_capacity_bytes)
    except Exception:
        pass
    kind = ""
    try:
        kind = jax.devices()[0].device_kind.lower()
    except Exception:
        pass
    two_tc = "v7" in kind
    if vmem_cap is None:
        vmem_cap = 64 * 1024 * 1024 if two_tc else 128 * 1024 * 1024
    return vmem_cap, two_tc


def _l1_partial_kernel(x_ref, y_ref, o_ref, *, block_rows, rows,
                       tiles_per_slice, needs_mask):
    """Accumulate an (8,128) f32 partial sum of |x - y| per slice."""
    c = pl.program_id(0)   # slice (one per TensorCore on v7x)
    i = pl.program_id(1)   # tile within slice (reduction axis)

    @pl.when(i == 0)
    def _init():
        o_ref[...] = jnp.zeros_like(o_ref)

    diff = x_ref[...].astype(jnp.float32) - y_ref[...].astype(jnp.float32)
    abs_diff = jnp.abs(diff)

    def _accumulate(vals):
        # (block_rows,128) -> (block_rows/8, 8, 128) is layout-preserving; the
        # axis-0 sum is pure VPU adds into the resident (8,128) accumulator.
        partial = jnp.sum(vals.reshape(-1, SUBLANE, LANE), axis=0)
        o_ref[...] += partial[None, :, :]

    if not needs_mask:
        _accumulate(abs_diff)
    else:
        # Logical (unclamped) tile index; clamped out-of-range tiles re-read
        # the last real tile's data but are fully masked to zero below.
        t = c * tiles_per_slice + i
        # Rows of this tile inside the real array (<= 0 for out-of-range tiles).
        # int32 math: fine for rows < 2**31 (~2.7e11 elements).
        valid_rows = rows - t * block_rows

        @pl.when(valid_rows >= block_rows)       # interior tile: no mask ops
        def _full():
            _accumulate(abs_diff)

        @pl.when(valid_rows < block_rows)        # ragged / clamped tile only
        def _ragged():
            row_ids = jax.lax.broadcasted_iota(jnp.int32, (block_rows, LANE), 0)
            _accumulate(jnp.where(row_ids < valid_rows, abs_diff, 0.0))


def l1_loss(x, y):
    """Equivalent of F.l1_loss(x, y.to(x.dtype).view_as(x)) (reduction='mean')."""
    y = y.reshape(x.shape)          # view_as(x); dtype stays native (cast in-kernel)
    n = x.size

    fx = x.reshape(-1)              # contiguous reshapes: no HBM copy
    fy = y.reshape(-1)

    # Rare fallback: only when n is not a multiple of 128, pad by < 128
    # elements (|0-0| = 0, divided out by the original n).  Every other ragged
    # case (rows not a multiple of 8 or of block_rows) is masked in-kernel, so
    # the common DL shapes never pay a full-array pad copy.
    # TODO(synk): lane-granularity in-kernel masking would need a 1-D block
    # view; kept this tiny pad for robustness of the 2-D lane-dense layout.
    pad = (-n) % LANE
    if pad:
        fx = jnp.pad(fx, (0, pad))
        fy = jnp.pad(fy, (0, pad))

    rows = fx.size // LANE
    xm = fx.reshape(rows, LANE)     # contiguous reshape: no HBM copy
    ym = fy.reshape(rows, LANE)

    vmem_cap, two_tc = _tpu_config()

    # Block rows: multiple of 8 (sublane constraint); may exceed `rows` for
    # tiny inputs, in which case the excess rows are masked in-kernel.
    block_rows = min(TARGET_BLOCK_ROWS, _round_up(rows, SUBLANE))
    tiles = pl.cdiv(rows, block_rows)

    # Leading slice axis: one partial per TensorCore.  Only worth it on v7x
    # (two TCs); single-TC chips would just get clamped re-reads + mask work.
    num_slices = 2 if (two_tc and tiles >= 2) else 1
    tiles_per_slice = pl.cdiv(tiles, num_slices)
    # Invariant: mask whenever the grid's row coverage differs from `rows`
    # (OOB VMEM contents are undefined, never assume zero).
    needs_mask = (num_slices * tiles_per_slice * block_rows) != rows

    def in_index(c, i):
        # Clamp out-of-range tiles onto the last real tile; their contribution
        # is masked to zero inside the kernel.
        return (jnp.minimum(c * tiles_per_slice + i, tiles - 1), 0)

    kernel = functools.partial(
        _l1_partial_kernel,
        block_rows=block_rows,
        rows=rows,
        tiles_per_slice=tiles_per_slice,
        needs_mask=needs_mask,
    )

    if num_slices > 1:
        # v7x: CORE_PARALLEL is what actually shards a grid axis across the two
        # TensorCores; plain "parallel" barely changes codegen.
        dim_sems = (getattr(pltpu, "CORE_PARALLEL", "parallel"),
                    getattr(pltpu, "ARBITRARY", "arbitrary"))
    else:
        dim_sems = ("parallel", "arbitrary")

    # Generation-aware VMEM budget: worst case (both inputs f32, 16K rows) is
    # 2 inputs x 2 pipeline bufs x 8 MiB = 32 MiB plus a few MiB of temps.
    vmem_limit = (48 * 1024 * 1024 if vmem_cap <= 64 * 1024 * 1024
                  else 64 * 1024 * 1024)

    partials = pl.pallas_call(
        kernel,
        out_shape=jax.ShapeDtypeStruct((num_slices, SUBLANE, LANE), jnp.float32),
        grid_spec=pltpu.PrefetchScalarGridSpec(
            num_scalar_prefetch=0,
            grid=(num_slices, tiles_per_slice),
            in_specs=[
                pl.BlockSpec((block_rows, LANE), in_index),
                pl.BlockSpec((block_rows, LANE), in_index),
            ],
            out_specs=pl.BlockSpec((1, SUBLANE, LANE), lambda c, i: (c, 0, 0)),
        ),
        compiler_params=pltpu.CompilerParams(
            dimension_semantics=dim_sems,
            vmem_limit_bytes=vmem_limit,
        ),
    )(xm, ym)

    total = jnp.sum(partials)               # tiny (num_slices*8*128) reduction
    return (total / jnp.float32(n)).astype(x.dtype)


if __name__ == "__main__":
    key = jax.random.PRNGKey(0)
    kx, ky = jax.random.split(key)

    # Small NCHW tensors consistent with a typical conv feature map.
    x = jax.random.normal(kx, (2, 4, 16, 16), dtype=jnp.float32)
    # y arrives in a different dtype (the torch module does y.to(x.dtype).view_as(x))
    y = jax.random.normal(ky, (2, 4, 16, 16), dtype=jnp.bfloat16)

    out = l1_loss(x, y)
    jax.block_until_ready(out)

    # cross-check against pure-JAX reference
    ref = jnp.mean(jnp.abs(x - y.astype(x.dtype).reshape(x.shape)))
    assert jnp.allclose(out, ref, atol=1e-5, rtol=1e-5), (out, ref)

    print("KERNEL_OK")
</pallas_src>

<mosaic_0001>
module attributes {stable_mosaic.version = 11 : i64} {
  func.func @_l1_partial_kernel(%arg0: i32, %arg1: i32, %arg2: memref<16x128xf32, #tpu.memory_space<vmem>>, %arg3: memref<16x128xbf16, #tpu.memory_space<vmem>>, %arg4: memref<1x8x128xf32, #tpu.memory_space<vmem>>) attributes {dimension_semantics = [#tpu.dimension_semantics<parallel>, #tpu.dimension_semantics<arbitrary>], iteration_bounds = array<i64: 1, 1>, scalar_prefetch = 0 : i64, scratch_operands = 0 : i64, tpu.core_type = #tpu.core_type<tc>, window_params = [{transform_indices = @transform_0, window_bounds = array<i64: 16, 128>}, {transform_indices = @transform_1, window_bounds = array<i64: 16, 128>}, {transform_indices = @transform_2, window_bounds = array<i64: 1, 8, 128>}]} {
    %c0_i32 = arith.constant 0 : i32
    %0 = arith.cmpi eq, %arg1, %c0_i32 : i32
    %1 = arith.extui %0 : i1 to i32
    %c0_i32_0 = arith.constant 0 : i32
    %2 = arith.cmpi ne, %1, %c0_i32_0 : i32
    scf.if %2 {
      %cst_10 = arith.constant 0.000000e+00 : f32
      %14 = vector.broadcast %cst_10 : f32 to vector<1x8x128xf32>
      %c0_11 = arith.constant 0 : index
      %c0_12 = arith.constant 0 : index
      %c0_13 = arith.constant 0 : index
      %15 = vector.load %arg4[%c0_11, %c0_12, %c0_13] : memref<1x8x128xf32, #tpu.memory_space<vmem>>, vector<1x8x128xf32>
      tpu.vector_store %arg4[%c0_11, %c0_12, %c0_13], %14 {strides = array<i32>} : memref<1x8x128xf32, #tpu.memory_space<vmem>>, vector<1x8x128xf32>,
    } else {
    }
    %c0 = arith.constant 0 : index
    %c0_1 = arith.constant 0 : index
    %3 = vector.load %arg2[%c0, %c0_1] : memref<16x128xf32, #tpu.memory_space<vmem>>, vector<16x128xf32>
    %c0_2 = arith.constant 0 : index
    %c0_3 = arith.constant 0 : index
    %4 = vector.load %arg3[%c0_2, %c0_3] : memref<16x128xbf16, #tpu.memory_space<vmem>>, vector<16x128xbf16>
    %5 = arith.extf %4 : vector<16x128xbf16> to vector<16x128xf32>
    %6 = arith.subf %3, %5 : vector<16x128xf32>
    %7 = math.absf %6 : vector<16x128xf32>
    %8 = vector.shape_cast %7 : vector<16x128xf32> to vector<2x8x128xf32>
    %cst = arith.constant dense<0.000000e+00> : vector<8x128xf32>
    %9 = vector.multi_reduction <add>, %8, %cst [0] : vector<2x8x128xf32> to vector<8x128xf32>
    %c0_4 = arith.constant 0 : index
    %c0_5 = arith.constant 0 : index
    %c0_6 = arith.constant 0 : index
    %10 = vector.load %arg4[%c0_4, %c0_5, %c0_6] : memref<1x8x128xf32, #tpu.memory_space<vmem>>, vector<1x8x128xf32>
    %11 = vector.shape_cast %9 : vector<8x128xf32> to vector<1x8x128xf32>
    %12 = arith.addf %10, %11 : vector<1x8x128xf32>
    %c0_7 = arith.constant 0 : index
    %c0_8 = arith.constant 0 : index
    %c0_9 = arith.constant 0 : index
    %13 = vector.load %arg4[%c0_7, %c0_8, %c0_9] : memref<1x8x128xf32, #tpu.memory_space<vmem>>, vector<1x8x128xf32>
    tpu.vector_store %arg4[%c0_7, %c0_8, %c0_9], %12 {strides = array<i32>} : memref<1x8x128xf32, #tpu.memory_space<vmem>>, vector<1x8x128xf32>,
    return
  }
  func.func @transform_0(%arg0: i32, %arg1: i32) -> (i32, i32) {
    %c1_i32 = arith.constant 1 : i32
    %0 = arith.muli %arg0, %c1_i32 : i32
    %1 = arith.addi %0, %arg1 : i32
    %c0_i32 = arith.constant 0 : i32
    %2 = arith.minsi %1, %c0_i32 : i32
    %c0_i32_0 = arith.constant 0 : i32
    %c0_i32_1 = arith.constant 0 : i32
    return %2, %c0_i32_0 : i32, i32
  }
  func.func @transform_1(%arg0: i32, %arg1: i32) -> (i32, i32) {
    %c1_i32 = arith.constant 1 : i32
    %0 = arith.muli %arg0, %c1_i32 : i32
    %1 = arith.addi %0, %arg1 : i32
    %c0_i32 = arith.constant 0 : i32
    %2 = arith.minsi %1, %c0_i32 : i32
    %c0_i32_0 = arith.constant 0 : i32
    %c0_i32_1 = arith.constant 0 : i32
    return %2, %c0_i32_0 : i32, i32
  }
  func.func @transform_2(%arg0: i32, %arg1: i32) -> (i32, i32, i32) {
    %c0_i32 = arith.constant 0 : i32
    %c0_i32_0 = arith.constant 0 : i32
    %c0_i32_1 = arith.constant 0 : i32
    return %arg0, %c0_i32, %c0_i32_0 : i32, i32, i32
  }
}

</mosaic_0001>

<bundles_post_ra>
// kernel: tpu_custom_call.1
= control target key start
LH: loop header
LB: loop body
LE: loop exit
PB: predicated region body
PF: predicated region fallthrough
CT: control target
= control target key end

     0   :  { %7 = vsyncpa [#allocation3], 0  ;;  %s241_s0 = inlined_call_operand.hbm [shape: f32[16,128], index: 0, kind: input, shape index: {}]   ;;  %s242_s1 = inlined_call_operand.hbm [shape: bf16[16,128], index: 1, kind: input, shape index: {}]   ;;  %s243_s2 = inlined_call_operand.hbm [shape: f32[1,8,128], index: 2, kind: output, shape index: {}]  }
   0x1   :  { %8 = vsyncpa [#allocation6], 0 }
   0x2   :  { %9 = vsyncpa [#allocation4], 0  ;;  %s183_s9 = smov [#allocation2]   ;;  %s111_s13 = scalar_lea.hbm %s241_s0, 256 }
   0x3   :  { %s21_s10 = sshll.u32 %s183_s9, 4  ;;  %p112_p0 = scmp.ne.s32.totalorder %s241_s0, %s111_s13  ;;  %s22_s10 = int_to_ptr.vmem [resolvable:$true] %s21_s10 }
   0x4   :  { %p115_p1 = scmp.lt.u32.totalorder %s111_s13, %s241_s0 }
   0x6   :  { %p117_p2 = pnand %p115_p1, %p112_p0 }
   0x8   :  { %120 = shalt.err (!%p117_p2)
}
   0x9   :  { %s121_s18 = scalar_lea.vmem %s22_s10, 256  ;;  %p126_p4 = scmp.lt.s32.totalorder %s22_s10, %s22_s10 }
   0xa   :  { %p122_p3 = scmp.ne.s32.totalorder %s22_s10, %s121_s18  ;;  %p127_p5 = scmp.lt.s32.totalorder %s121_s18, %s121_s18 }
   0xc   :  { %p128_p6 = por %p127_p5, %p126_p4 }
   0xe   :  { %p129_p7 = pnand %p128_p6, %p122_p3 }
  0x10   :  { %132 = shalt.err (!%p129_p7)
}
  0x11   :  { %s184_s19 = smov 128   ;;  %s185_s20 = smov 8  }
  0x12   :  { %27 = dma.hbm_to_vmem [thread:$0]  %s241_s0, 256, %s22_s10, [#allocation3], %s184_s19, %s184_s19, %s185_s20  }
  0x13   :  { %s186_s23 = smov [#allocation5]   ;;  %s133_s27 = scalar_lea.hbm %s242_s1, 128 }
  0x14   :  { %s39_s24 = sshll.u32 %s186_s23, 4  ;;  %p134_p8 = scmp.ne.s32.totalorder %s242_s1, %s133_s27  ;;  %s40_s24 = int_to_ptr.vmem [resolvable:$true] %s39_s24 }
  0x15   :  { %p137_p9 = scmp.lt.u32.totalorder %s133_s27, %s242_s1 }
  0x17   :  { %p139_p10 = pnand %p137_p9, %p134_p8 }
  0x19   :  { %142 = shalt.err (!%p139_p10)
}
  0x1a   :  { %s143_s4 = scalar_lea.vmem %s40_s24, 128  ;;  %p148_p12 = scmp.lt.s32.totalorder %s40_s24, %s40_s24 }
  0x1b   :  { %p144_p11 = scmp.ne.s32.totalorder %s40_s24, %s143_s4  ;;  %p149_p13 = scmp.lt.s32.totalorder %s143_s4, %s143_s4 }
  0x1d   :  { %p150_p0 = por %p149_p13, %p148_p12 }
  0x1f   :  { %p151_p1 = pnand %p150_p0, %p144_p11 }
  0x21   :  { %154 = shalt.err (!%p151_p1)
}
  0x22   :  { %s187_s0 = smov 64   ;;  %s188_s5 = smov 4  }
  0x23   :  { %45 = dma.hbm_to_vmem [thread:$0]  %s242_s1, 128, %s40_s24, [#allocation6], %s187_s0, %s187_s0, %s188_s5  }
  0x24   :  { %177 = dma.done.wait [#allocation3], 256  }
  0x25   :  { %178 = vsyncadd [#allocation3], 4294967040 }
  0x26   :  { %179 = dma.done.wait [#allocation6], 128  }
  0x27   :  { %180 = vsyncadd [#allocation6], 4294967168  ;;  %v65_v0 = vld [vmem:[#allocation2] sm:$0xff]  ;;  %v66_v1 = vld [vmem:[#allocation2 + $0x8] sm:$0xff]  ;;  %s189_s8 = smov [#allocation7]  }
  0x28   :  { %v100_v2 = vld [vmem:[#allocation5] sm:$0xff]   ;;  %s85_s9 = sshll.u32 %s189_s8, 4  ;;  %s86_s9 = int_to_ptr.vmem [resolvable:$true] %s85_s9 }
  0x29   :  { %v101_v3 = vunpack.c.l.bf16 %v100_v2  ;;  %v102_v4 = vunpack.c.h.bf16 %v100_v2  ;;  %s155_s10 = scalar_lea.vmem %s86_s9, 128  ;;  %p160_p3 = scmp.lt.s32.totalorder %s86_s9, %s86_s9 }
  0x2a   :  { %p156_p2 = scmp.ne.s32.totalorder %s86_s9, %s155_s10  ;;  %p161_p4 = scmp.lt.s32.totalorder %s155_s10, %s155_s10 }
  0x2b   :  { %v71_v5 = vsub.f32 %v65_v0, %v101_v3  ;;  %v72_v6 = vsub.f32 %v66_v1, %v102_v4 }
  0x2c   :  { %p162_p5 = por %p161_p4, %p160_p3 }
  0x2d   :  { %v73_v7 = vand.u32 2147483647, %v71_v5  ;;  %v74_v8 = vand.u32 2147483647, %v72_v6 }
  0x2e   :  { %p163_p6 = pnand %p162_p5, %p156_p2 }
  0x2f   :  { %v75_v9 = vadd.f32 %v74_v8, %v73_v7 }
  0x31   :  { %78 = vst [vmem:[#allocation7] sm:$0xff] %v75_v9 }
  0x32   :  { %166 = shalt.err (!%p163_p6)
}
  0x33   :  { %s167_s12 = scalar_lea.hbm %s243_s2, 128 }
  0x34   :  { %p168_p7 = scmp.ne.s32.totalorder %s243_s2, %s167_s12  ;;  %p171_p8 = scmp.lt.u32.totalorder %s167_s12, %s243_s2 }
  0x36   :  { %p173_p9 = pnand %p171_p8, %p168_p7 }
  0x38   :  { %176 = shalt.err (!%p173_p9)
}
  0x39   :  { %88 = dma.vmem_to_hbm [thread:$0]  %s86_s9, 128, %s243_s2, [#allocation4]  }
  0x3a   :  { %181 = dma.done.wait [#allocation4], 128  }
  0x3b   :  { %182 = vsyncadd [#allocation4], 4294967168 }
  0x3c   :  { %92 = vsyncpa [#allocation3], 1 }
  0x3d   :  { %93 = vsyncpa [#allocation6], 1 }
  0x3e   :  { %94 = vsyncpa [#allocation4], 1 }

</bundles_post_ra>
